<compile_context>
chip_gen: v7x
topology: tpu7x:2x2x1
jax: 0.10.0
libtpu: 0.0.40
codegen_flags: <defaults>
</compile_context>

<pallas_src>
import functools

import jax
import jax.numpy as jnp
from jax import lax
from jax.experimental import pallas as pl
from jax.experimental.pallas import tpu as pltpu

_NCORES = 2  # outer "parallel" axis: both v7x TensorCores; serial on v5e/v6e


def _round_up(x: int, m: int) -> int:
    return ((x + m - 1) // m) * m


def _vmem_capacity_bytes() -> int:
    try:
        return int(pltpu.get_tpu_info().vmem_capacity_bytes)
    except Exception:
        return 64 * 1024 * 1024  # conservative default (v7x per-core VMEM)


def _auto_tile_n(n: int, c: int, itemsize: int, sub: int, budget: int) -> int:
    # Honest per-row VMEM cost: double-buffered logits tile plus ~6 full-width
    # f32 temporaries (f32 upcast, iota, onehot mask, weights, x*w, exp(x-m))
    # plus the narrow (tile_n, 1) columns (m/lse/loss/accumulator).
    bytes_per_row = c * (2 * itemsize + 6 * 4) + 16
    t = budget // max(bytes_per_row, 1)
    t = min(t, _round_up(n, sub))
    t = max(sub, (t // sub) * sub)
    return int(t)


def _ls_ce_kernel(pred_ref, tgt_ref, out_ref, acc_ref, *,
                  smoothing, n_valid, tile_n, steps_per_core):
    """One grid step: partial label-smoothed CE sum over a batch tile.

    acc_ref is a (tile_n, 1) f32 running sum (per core); the per-core scalar
    partial sum is written (broadcast over an (8,128) block) once at the end.
    """
    c = pl.program_id(0)          # core slice (parallel)
    i = pl.program_id(1)          # batch-tile step within this core (reduction)

    @pl.when(i == 0)
    def _():
        acc_ref[...] = jnp.zeros_like(acc_ref)

    x = pred_ref[...].astype(jnp.float32)                               # (TN, C)

    # numerically-stable logsumexp along the class (lane) dim
    m = jnp.max(x, axis=-1, keepdims=True)                              # (TN, 1)
    lse = jnp.log(jnp.sum(jnp.exp(x - m), axis=-1, keepdims=True))      # (TN, 1)

    # merged target-gather + mean: one weighted lane reduction
    num_classes = x.shape[-1]
    confidence = 1.0 - smoothing
    base = smoothing / num_classes
    col = lax.broadcasted_iota(jnp.int32, x.shape, 1)                   # (TN, C)
    w = jnp.where(col == tgt_ref[...], confidence + base, base)         # (TN, C)
    xw = jnp.sum(x * w, axis=-1, keepdims=True)                         # (TN, 1)

    # loss_row = confidence*nll + smoothing*smooth  ==  (m + lse) - sum(x*w)
    loss = (m + lse) - xw                                               # (TN, 1)

    t_idx = c * steps_per_core + i           # logical tile index
    tile_start = t_idx * tile_n

    @pl.when(tile_start + tile_n <= n_valid)
    def _():                                 # full interior tile: no masking
        acc_ref[...] += loss

    @pl.when(tile_start + tile_n > n_valid)
    def _():                                 # partial / overflow tile: mask rows
        row = tile_start + lax.broadcasted_iota(jnp.int32, loss.shape, 0)
        acc_ref[...] += jnp.where(row < n_valid, loss, 0.0)

    @pl.when(i == steps_per_core - 1)
    def _():
        out_ref[...] = jnp.zeros_like(out_ref) + jnp.sum(acc_ref[...])


def label_smooth_cross_entropy(pred: jax.Array, target: jax.Array,
                               smoothing: float = 0.1,
                               tile_n: int | None = None) -> jax.Array:
    """pred: (N, C) float logits; target: (N,) int labels. Returns scalar f32 mean loss."""
    assert smoothing < 1.0
    N, C = pred.shape
    itemsize = jnp.dtype(pred.dtype).itemsize
    sub = 16 if itemsize < 4 else 8                 # sublane multiple per dtype

    vmem_cap = _vmem_capacity_bytes()
    # ~40 MiB scoped on v7x (64 MiB VMEM), ~80 MiB on v5e/v6e (128 MiB VMEM)
    vmem_limit = min((vmem_cap * 5) // 8, 80 * 1024 * 1024)
    if tile_n is None:
        tile_n = _auto_tile_n(N, C, itemsize, sub, vmem_limit // 2)
    tile_n = int(min(tile_n, _round_up(N, sub)))
    tile_n = max(sub, (tile_n // sub) * sub)

    num_tiles = pl.cdiv(N, tile_n)
    steps_per_core = pl.cdiv(num_tiles, _NCORES)
    last_block = num_tiles - 1

    tgt2d = target.astype(jnp.int32).reshape(N, 1)

    def block_map(c, i):
        # Clamp overflow steps (num_tiles not a multiple of _NCORES) onto the
        # last valid tile; those rows are fully masked inside the kernel.
        return (jnp.minimum(c * steps_per_core + i, last_block), 0)

    logits_spec_kwargs = {}
    if tile_n * C * itemsize <= 2 * 1024 * 1024 and steps_per_core >= 8:
        # small tiles + deep loop: 3-deep buffering keeps the HBM stream busy
        logits_spec_kwargs["pipeline_mode"] = pl.Buffered(3)

    kernel = functools.partial(
        _ls_ce_kernel,
        smoothing=float(smoothing),
        n_valid=N,
        tile_n=tile_n,
        steps_per_core=steps_per_core,
    )

    out = pl.pallas_call(
        kernel,
        out_shape=jax.ShapeDtypeStruct((_NCORES * 8, 128), jnp.float32),
        grid_spec=pltpu.PrefetchScalarGridSpec(
            num_scalar_prefetch=0,
            grid=(_NCORES, steps_per_core),
            in_specs=[
                pl.BlockSpec((tile_n, C), block_map, **logits_spec_kwargs),  # logits
                pl.BlockSpec((tile_n, 1), block_map),                        # targets
            ],
            out_specs=pl.BlockSpec((8, 128), lambda c, i: (c, 0)),  # per-core partial
            scratch_shapes=[pltpu.VMEM((tile_n, 1), jnp.float32)],  # running sum
        ),
        compiler_params=pltpu.CompilerParams(
            dimension_semantics=("parallel", "arbitrary"),
            vmem_limit_bytes=int(vmem_limit),
        ),
    )(pred, tgt2d)

    partials = out.reshape(_NCORES, 8, 128)[:, 0, 0]    # per-core partial sums
    return jnp.sum(partials) * (1.0 / float(N))


def _reference(pred, target, smoothing=0.1):
    logp = jax.nn.log_softmax(pred.astype(jnp.float32), axis=-1)
    nll = -jnp.take_along_axis(logp, target[:, None].astype(jnp.int32), axis=-1)[:, 0]
    smooth = -jnp.mean(logp, axis=-1)
    return jnp.mean((1.0 - smoothing) * nll + smoothing * smooth)


if __name__ == "__main__":
    key = jax.random.PRNGKey(0)
    k1, k2 = jax.random.split(key)
    N, C = 16, 32                      # small batch of 16 samples, 32 classes
    pred = jax.random.normal(k1, (N, C), dtype=jnp.float32)
    target = jax.random.randint(k2, (N,), 0, C, dtype=jnp.int32)

    loss = jax.block_until_ready(label_smooth_cross_entropy(pred, target, smoothing=0.1))
    ref = _reference(pred, target, smoothing=0.1)
    assert jnp.allclose(loss, ref, atol=1e-5, rtol=1e-5), (loss, ref)

    # non-divisible batch -> exercises the unpadded partial-tile masking path
    N2 = 13
    pred2 = jax.random.normal(k1, (N2, C), dtype=jnp.float32)
    target2 = jax.random.randint(k2, (N2,), 0, C, dtype=jnp.int32)
    loss2 = jax.block_until_ready(
        label_smooth_cross_entropy(pred2, target2, smoothing=0.1))
    ref2 = _reference(pred2, target2, smoothing=0.1)
    assert jnp.allclose(loss2, ref2, atol=1e-5, rtol=1e-5), (loss2, ref2)

    # bf16 logits (halves HBM traffic; kernel upcasts to f32 internally)
    pred_bf16 = pred.astype(jnp.bfloat16)
    loss3 = jax.block_until_ready(
        label_smooth_cross_entropy(pred_bf16, target, smoothing=0.1))
    ref3 = _reference(pred_bf16.astype(jnp.float32), target, smoothing=0.1)
    assert jnp.allclose(loss3, ref3, atol=1e-4, rtol=1e-4), (loss3, ref3)

    print("KERNEL_OK")
</pallas_src>

<mosaic_0001>
module attributes {stable_mosaic.version = 11 : i64} {
  func.func @_ls_ce_kernel(%arg0: i32, %arg1: i32, %arg2: memref<16x32xf32, #tpu.memory_space<vmem>>, %arg3: memref<16x1xi32, #tpu.memory_space<vmem>>, %arg4: memref<8x128xf32, #tpu.memory_space<vmem>>, %arg5: memref<16x1xf32, #tpu.memory_space<vmem>>) attributes {dimension_semantics = [#tpu.dimension_semantics<parallel>, #tpu.dimension_semantics<arbitrary>], iteration_bounds = array<i64: 2, 1>, scalar_prefetch = 0 : i64, scratch_operands = 1 : i64, tpu.core_type = #tpu.core_type<tc>, window_params = [{transform_indices = @transform_0, window_bounds = array<i64: 16, 32>}, {transform_indices = @transform_1, window_bounds = array<i64: 16, 1>}, {transform_indices = @transform_2, window_bounds = array<i64: 8, 128>}]} {
    %c0_i32 = arith.constant 0 : i32
    %0 = arith.cmpi eq, %arg1, %c0_i32 : i32
    %1 = arith.extui %0 : i1 to i32
    %c0_i32_0 = arith.constant 0 : i32
    %2 = arith.cmpi ne, %1, %c0_i32_0 : i32
    scf.if %2 {
      %cst_16 = arith.constant 0.000000e+00 : f32
      %38 = vector.broadcast %cst_16 : f32 to vector<16x1xf32>
      %c0_17 = arith.constant 0 : index
      %c0_18 = arith.constant 0 : index
      %39 = vector.load %arg5[%c0_17, %c0_18] : memref<16x1xf32, #tpu.memory_space<vmem>>, vector<16x1xf32>
      tpu.vector_store %arg5[%c0_17, %c0_18], %38 {strides = array<i32>} : memref<16x1xf32, #tpu.memory_space<vmem>>, vector<16x1xf32>,
    } else {
    }
    %c0 = arith.constant 0 : index
    %c0_1 = arith.constant 0 : index
    %3 = vector.load %arg2[%c0, %c0_1] : memref<16x32xf32, #tpu.memory_space<vmem>>, vector<16x32xf32>
    %cst = arith.constant dense<0xFF800000> : vector<16xf32>
    %4 = vector.multi_reduction <maximumf>, %3, %cst [1] : vector<16x32xf32> to vector<16xf32>
    %5 = vector.shape_cast %4 : vector<16xf32> to vector<16x1xf32>
    %6 = vector.broadcast %5 : vector<16x1xf32> to vector<16x32xf32>
    %7 = arith.subf %3, %6 : vector<16x32xf32>
    %8 = math.exp %7 : vector<16x32xf32>
    %cst_2 = arith.constant dense<0.000000e+00> : vector<16xf32>
    %9 = vector.multi_reduction <add>, %8, %cst_2 [1] : vector<16x32xf32> to vector<16xf32>
    %10 = vector.shape_cast %9 : vector<16xf32> to vector<16x1xf32>
    %11 = math.log %10 : vector<16x1xf32>
    %12 = tpu.iota {dimensions = array<i32: 1>} : vector<16x32xi32>
    %c0_3 = arith.constant 0 : index
    %c0_4 = arith.constant 0 : index
    %13 = vector.load %arg3[%c0_3, %c0_4] : memref<16x1xi32, #tpu.memory_space<vmem>>, vector<16x1xi32>
    %14 = vector.broadcast %13 : vector<16x1xi32> to vector<16x32xi32>
    %15 = arith.cmpi eq, %12, %14 : vector<16x32xi32>
    %cst_5 = arith.constant 0.903124988 : f32
    %cst_6 = arith.constant 3.125000e-03 : f32
    %16 = vector.broadcast %cst_5 : f32 to vector<16x32xf32>
    %17 = vector.broadcast %cst_6 : f32 to vector<16x32xf32>
    %18 = arith.select %15, %16, %17 : vector<16x32xi1>, vector<16x32xf32>
    %19 = arith.mulf %3, %18 : vector<16x32xf32>
    %cst_7 = arith.constant dense<0.000000e+00> : vector<16xf32>
    %20 = vector.multi_reduction <add>, %19, %cst_7 [1] : vector<16x32xf32> to vector<16xf32>
    %21 = vector.shape_cast %20 : vector<16xf32> to vector<16x1xf32>
    %22 = arith.addf %5, %11 : vector<16x1xf32>
    %23 = arith.subf %22, %21 : vector<16x1xf32>
    %c1_i32 = arith.constant 1 : i32
    %24 = arith.muli %arg0, %c1_i32 : i32
    %25 = arith.addi %24, %arg1 : i32
    %c16_i32 = arith.constant 16 : i32
    %26 = arith.muli %25, %c16_i32 : i32
    %c16_i32_8 = arith.constant 16 : i32
    %27 = arith.addi %26, %c16_i32_8 : i32
    %c16_i32_9 = arith.constant 16 : i32
    %28 = arith.cmpi sle, %27, %c16_i32_9 : i32
    %29 = arith.extui %28 : i1 to i32
    %c0_i32_10 = arith.constant 0 : i32
    %30 = arith.cmpi ne, %29, %c0_i32_10 : i32
    scf.if %30 {
      %c0_16 = arith.constant 0 : index
      %c0_17 = arith.constant 0 : index
      %38 = vector.load %arg5[%c0_16, %c0_17] : memref<16x1xf32, #tpu.memory_space<vmem>>, vector<16x1xf32>
      %39 = arith.addf %38, %23 : vector<16x1xf32>
      %c0_18 = arith.constant 0 : index
      %c0_19 = arith.constant 0 : index
      %40 = vector.load %arg5[%c0_18, %c0_19] : memref<16x1xf32, #tpu.memory_space<vmem>>, vector<16x1xf32>
      tpu.vector_store %arg5[%c0_18, %c0_19], %39 {strides = array<i32>} : memref<16x1xf32, #tpu.memory_space<vmem>>, vector<16x1xf32>,
    } else {
    }
    %c16_i32_11 = arith.constant 16 : i32
    %31 = arith.addi %26, %c16_i32_11 : i32
    %c16_i32_12 = arith.constant 16 : i32
    %32 = arith.cmpi sgt, %31, %c16_i32_12 : i32
    %33 = arith.extui %32 : i1 to i32
    %c0_i32_13 = arith.constant 0 : i32
    %34 = arith.cmpi ne, %33, %c0_i32_13 : i32
    scf.if %34 {
      %38 = tpu.iota {dimensions = array<i32: 0>} : vector<16x1xi32>
      %39 = vector.broadcast %26 : i32 to vector<16x1xi32>
      %40 = arith.addi %39, %38 : vector<16x1xi32>
      %c0_16 = arith.constant 0 : index
      %c0_17 = arith.constant 0 : index
      %41 = vector.load %arg5[%c0_16, %c0_17] : memref<16x1xf32, #tpu.memory_space<vmem>>, vector<16x1xf32>
      %c16_i32_18 = arith.constant 16 : i32
      %42 = vector.broadcast %c16_i32_18 : i32 to vector<16x1xi32>
      %43 = arith.cmpi slt, %40, %42 : vector<16x1xi32>
      %cst_19 = arith.constant 0.000000e+00 : f32
      %44 = vector.broadcast %cst_19 : f32 to vector<16x1xf32>
      %45 = arith.select %43, %23, %44 : vector<16x1xi1>, vector<16x1xf32>
      %46 = arith.addf %41, %45 : vector<16x1xf32>
      %c0_20 = arith.constant 0 : index
      %c0_21 = arith.constant 0 : index
      %47 = vector.load %arg5[%c0_20, %c0_21] : memref<16x1xf32, #tpu.memory_space<vmem>>, vector<16x1xf32>
      tpu.vector_store %arg5[%c0_20, %c0_21], %46 {strides = array<i32>} : memref<16x1xf32, #tpu.memory_space<vmem>>, vector<16x1xf32>,
    } else {
    }
    %c0_i32_14 = arith.constant 0 : i32
    %35 = arith.cmpi eq, %arg1, %c0_i32_14 : i32
    %36 = arith.extui %35 : i1 to i32
    %c0_i32_15 = arith.constant 0 : i32
    %37 = arith.cmpi ne, %36, %c0_i32_15 : i32
    scf.if %37 {
      %cst_16 = arith.constant 0.000000e+00 : f32
      %38 = vector.broadcast %cst_16 : f32 to vector<8x128xf32>
      %c0_17 = arith.constant 0 : index
      %c0_18 = arith.constant 0 : index
      %39 = vector.load %arg5[%c0_17, %c0_18] : memref<16x1xf32, #tpu.memory_space<vmem>>, vector<16x1xf32>
      %40 = vector.shape_cast %39 : vector<16x1xf32> to vector<1x16x1xf32>
      %cst_19 = arith.constant dense<0.000000e+00> : vector<1xf32>
      %41 = vector.multi_reduction <add>, %40, %cst_19 [1, 2] : vector<1x16x1xf32> to vector<1xf32>
      %42 = vector.shape_cast %41 : vector<1xf32> to vector<1x1x1xf32>
      %43 = vector.extract %42[0, 0, 0] : f32 from vector<1x1x1xf32>
      %44 = vector.broadcast %43 : f32 to vector<8x128xf32>
      %45 = arith.addf %38, %44 : vector<8x128xf32>
      %c0_20 = arith.constant 0 : index
      %c0_21 = arith.constant 0 : index
      %46 = vector.load %arg4[%c0_20, %c0_21] : memref<8x128xf32, #tpu.memory_space<vmem>>, vector<8x128xf32>
      tpu.vector_store %arg4[%c0_20, %c0_21], %45 {strides = array<i32>} : memref<8x128xf32, #tpu.memory_space<vmem>>, vector<8x128xf32>,
    } else {
    }
    return
  }
  func.func @transform_0(%arg0: i32, %arg1: i32) -> (i32, i32) {
    %c1_i32 = arith.constant 1 : i32
    %0 = arith.muli %arg0, %c1_i32 : i32
    %1 = arith.addi %0, %arg1 : i32
    %c0_i32 = arith.constant 0 : i32
    %2 = arith.minsi %1, %c0_i32 : i32
    %c0_i32_0 = arith.constant 0 : i32
    %c0_i32_1 = arith.constant 0 : i32
    return %2, %c0_i32_0 : i32, i32
  }
  func.func @transform_1(%arg0: i32, %arg1: i32) -> (i32, i32) {
    %c1_i32 = arith.constant 1 : i32
    %0 = arith.muli %arg0, %c1_i32 : i32
    %1 = arith.addi %0, %arg1 : i32
    %c0_i32 = arith.constant 0 : i32
    %2 = arith.minsi %1, %c0_i32 : i32
    %c0_i32_0 = arith.constant 0 : i32
    %c0_i32_1 = arith.constant 0 : i32
    return %2, %c0_i32_0 : i32, i32
  }
  func.func @transform_2(%arg0: i32, %arg1: i32) -> (i32, i32) {
    %c0_i32 = arith.constant 0 : i32
    %c0_i32_0 = arith.constant 0 : i32
    return %arg0, %c0_i32 : i32, i32
  }
}

</mosaic_0001>

<bundles_post_ra>
// kernel: tpu_custom_call.1
= control target key start
LH: loop header
LB: loop body
LE: loop exit
PB: predicated region body
PF: predicated region fallthrough
CT: control target
= control target key end

     0   :  { %7 = vsyncpa [#allocation4], 0  ;;  %s758_s0 = inlined_call_operand.vmem [shape: f32[16,32], index: 0, kind: input, shape index: {}]   ;;  %s759_s1 = inlined_call_operand.vmem [shape: s32[16,1], index: 1, kind: input, shape index: {}]   ;;  %s760_s2 = inlined_call_operand.hbm [shape: f32[16,128], index: 2, kind: output, shape index: {}]  }
   0x1   :  { %9 = vsyncpa [#allocation4 + $0x1], 0  ;;  %s613_s9 = smov 0   ;;  %s615_s10 = smov 0  }
   0x2   :  { %s617_s11 = smov 0   ;;  %s619_s12 = smov 0  }
   0x3   :  { %s621_s13 = smov 0   ;;  %s623_s14 = smov 0  }
   0x4 LB: > { %s427_s15 = sadd.s32 4294967295, %s592_s14   ;;  %s428_s16 = sadd.s32 4294967294, %s592_s14   ;;  %s592_s14 = sphi %s623_s14, %s15_s14   ;;  %s588_s13 = sphi %s621_s13, %s767_s13   ;;  %s584_s12 = sphi %s619_s12, %s766_s12   ;;  %s580_s11 = sphi %s617_s11, %s765_s11   ;;  %s576_s10 = sphi %s615_s10, %s764_s10   ;;  %s572_s9 = sphi %s613_s9, %s763_s9  }
   0x5   : > { %s27_s17 = sadd.s32 1, %s588_s13  ;;  %s98_s18 = sadd.s32 1, %s580_s11 }
   0x6   : > { %p29_p0 = scmp.ge.s32.totalorder %s27_s17, 2  ;;  %p108_p1 = scmp.ne.s32.totalorder %s580_s11, %s576_s10 }
   0x7   : > { %p109_p2 = scmp.eq.s32.totalorder %s427_s15, 1  ;;  %p114_p3 = scmp.ne.s32.totalorder %s576_s10, %s572_s9 }
   0x8   : > { %s769_s17 = smov (%p29_p0, %s27_s17), 0  ;;  %p115_p5 = scmp.eq.s32.totalorder %s428_s16, 1 }
   0x9   : > { %p653_p4 = por %p109_p2, %p108_p1  ;;  %s95_s20 = ssub.s32 %s588_s13, %s769_s17 }
   0xa   : > { %p431_p6 = scmp.ge.s32.totalorder %s592_s14, 1  ;;  %p96_p7 = scmp.eq.s32.totalorder %s95_s20, 0 }
   0xb   : > { %p660_p8 = por %p115_p5, %p114_p3  ;;  %p163_p9 = scmp.lt.s32.totalorder %s592_s14, 3 }
   0xc   : > { %s666_s22 = scalar_select %p96_p7, %s580_s11, %s98_s18  }
   0xd   : > { %p164_p10 = pnand %p431_p6, %p163_p9 }
   0xe   : > { %p197_p11 = scmp.lt.s32.totalorder (!%p164_p10), %s584_s12, 0  ;;  %v594_v0 = vmov (!%p164_p10), 0   ;;  %vm229_vm0 = vcmask (!%p164_p10), 261120   ;;  %v252_v8 = vlaneseq (!%p164_p10)  ;;  %v595_v17 = vmov (!%p164_p10), 0.003125   ;;  %s193_s4 = sand.u32 (!%p164_p10), 1, %s576_s10  }
   0xf   : > { %167 = sbr.rel (%p164_p10) target bundleno = 598 (0x256), region = 28  ;;  %504 = vset.pattern.permute.xlu1 (!%p164_p10), %v594_v0  ;;  %505 = vset.pattern.permute.xlu0 (!%p164_p10), %v594_v0  ;;  %s685_s5 = sshll.u32 (!%p164_p10), %s193_s4, 3  ;;  %vm224_vm3 = vcmask (!%p164_p10), 7168   ;;  %v596_v28 = vmov (!%p164_p10), 0.0  }
  0x10   : > { %v253_v13 = vand.u32 (!%p164_p10), 127, %v252_v8  ;;  %s437_s6 = sshll.u32 (!%p164_p10), %s584_s12, 4  ;;  %225 = vst.msk [vmem:[#allocation2] sm:$0xff] (!%p164_p10), %vm224_vm3, %v596_v28  ;;  %226 = vst.msk [vmem:[#allocation2 + $0x8] sm:$0xff] (!%p164_p10), %vm224_vm3, %v596_v28  ;;  %s195_s8 = scalar_lea.vmem (!%p164_p10), [#allocation3], %s685_s5 }
  0x11   : > { %s280_s7 = sadd.s32 (!%p164_p10), 16, %s437_s6 }
  0x12   : > { %p438_p13 = scmp.gt.s32.totalorder (!%p164_p10), %s280_s7, 16 }
  0x16   : > { %s198_s23 = scalar_select %p197_p11, %s584_s12, 0 }
  0x17   : > { %v285_v41 = vld [vmem:[#allocation2] sm:$0xff] (!%p438_p13)  ;;  %v286_v42 = vld [vmem:[#allocation2 + $0x8] sm:$0xff] (!%p438_p13) }
  0x18   : > { %s433_s24 = sshll.u32 %s198_s23, 1 }
  0x19   : > { %p200_p12 = scmp.lt.s32.totalorder %s433_s24, 1 }
  0x1b   : > { %s771_s24 = smov (!%p200_p12, %s433_s24), 1 }
  0x1c   : > { %s434_s25 = sshll.u32 %s771_s24, 3 }
  0x1d   : > { %s203_s28 = scalar_lea.vmem %s758_s0, %s434_s25  ;;  %s215_s3 = scalar_lea.vmem %s759_s1, %s434_s25 }
  0x1e   : > { %v227_v1 = vld [vmem:[%s203_s28] sm:$0xff]  ;;  %v228_v2 = vld [vmem:[%s203_s28 + $0x8] sm:$0xff] }
  0x1f   : > { %v254_v3 = vld [vmem:[%s215_s3] sm:$0xff]  ;;  %v230_v4 = vsel %vm229_vm0, %v227_v1, -inf  ;;  %v255_v5 = vld [vmem:[%s215_s3 + $0x8] sm:$0xff]  ;;  %v233_v6 = vsel %vm229_vm0, %v228_v2, -inf }
  0x20   : > { %257 = vperm.xlu1 %504, %v254_v3   ;;  %231 = vmax.xlane.f32.xlu0 %v230_v4 }
  0x24   : > { %260 = vperm.xlu1 %504, %v255_v5   ;;  %234 = vmax.xlane.f32.xlu0 %v233_v6 }
  0x9f   : > { %v258_v11 = vpop.permute.xlu1 %257 }
  0xa0   : > { %vm262_vm1 = vcmp.eq.s32.totalorder %v253_v13, %v258_v11 }
  0xa1   : > { %v264_v18 = vsel %vm262_vm1, 0.903125, %v595_v17 }
  0xa2   : > { %v266_v19 = vmul.f32 %v264_v18, %v227_v1 }
  0xa3   : > { %v261_v16 = vpop.permute.xlu1 %260 }
  0xa4   : > { %vm263_vm2 = vcmp.eq.s32.totalorder %v253_v13, %v261_v16  ;;  %v268_v23 = vsel %vm229_vm0, %v266_v19, 0.0 }
  0xa5   : > { %v265_v21 = vsel %vm263_vm2, 0.903125, %v595_v17 }
  0xa6   : > { %v267_v24 = vmul.f32 %v265_v21, %v228_v2 }
  0xa8   : > { %v271_v27 = vsel %vm229_vm0, %v267_v24, 0.0 }
  0xad   : > { %v232_v7 = vpop.xlane.xlu0 %231 }
  0xae   : > { %v236_v9 = vsub.f32 %v227_v1, %v232_v7 }
  0xb0   : > { %v238_v10 = vmul.f32 1.442695, %v236_v9 }
  0xb1   : > { %v235_v12 = vpop.xlane.xlu0 %234 }
  0xb2   : > { %506 = vpow2.f32 %v238_v10  ;;  %v237_v14 = vsub.f32 %v228_v2, %v235_v12 }
  0xb4   : > { %v240_v15 = vmul.f32 1.442695, %v237_v14 }
  0xb6   : > { %508 = vpow2.f32 %v240_v15 }
  0xbc   : > { %v507_v20 = vpop.eup %506 }
  0xbd   : > { %v242_v22 = vsel %vm229_vm0, %v507_v20, 0.0 }
  0xbe   : > { %243 = vadd.xlane.f32.xlu0 %v242_v22 }
  0xc0   : > { %v509_v25 = vpop.eup %508 }
  0xc1   : > { %v245_v26 = vsel %vm229_vm0, %v509_v25, 0.0 }
  0xc2   : > { %246 = vadd.xlane.f32.xlu1 %v245_v26  ;;  %269 = vadd.xlane.f32.xlu0 %v268_v23 }
  0xc6   : > { %272 = vadd.xlane.f32.xlu0 %v271_v27 }
 0x14b   : > { %v244_v29 = vpop.xlane.xlu0 %243 }
 0x14c   : > { %510 = vlog2.f32 %v244_v29 }
 0x14f   : > { %v247_v30 = vpop.xlane.xlu1 %246  ;;  %v270_v33 = vpop.xlane.xlu0 %269 }
 0x150   : > { %512 = vlog2.f32 %v247_v30 }
 0x153   : > { %v273_v39 = vpop.xlane.xlu0 %272 }
 0x156   : > { %v511_v31 = vpop.eup %510 }
 0x157   : > { %v249_v32 = vmul.f32 0.6931472, %v511_v31 }
 0x159   : > { %v274_v34 = vadd.f32 %v249_v32, %v232_v7  ;;  %284 = sbr.rel (%p438_p13) target bundleno = 356 (0x164), region = 36 }
 0x15a   : > { %v513_v35 = vpop.eup %512 }
 0x15b   : > { %v251_v36 = vmul.f32 0.6931472, %v513_v35  ;;  %v276_v37 = vsub.f32 %v274_v34, %v270_v33 }
 0x15d   : > { %v275_v38 = vadd.f32 %v251_v36, %v235_v12  ;;  %v287_v43 = vadd.f32 (!%p438_p13), %v285_v41, %v276_v37 }
 0x15f   : > { %v277_v40 = vsub.f32 %v275_v38, %v273_v39  ;;  %290 = vst.msk [vmem:[#allocation2] sm:$0xff] (!%p438_p13), %vm224_vm3, %v287_v43 }
 0x161   : > { %v288_v44 = vadd.f32 %v286_v42, %v277_v40 }
 0x163   : > { %291 = vst.msk [vmem:[#allocation2 + $0x8] sm:$0xff] %vm224_vm3, %v288_v44 }
 0x164 PF: > { %p439_p0 = scmp.le.s32.totalorder %s280_s7, 16 }
 0x165   : > { %v297_v45 = vshrl.u32 (!%p439_p0), %v252_v8, 7  ;;  %v299_v46 = vstv (!%p439_p0), %s437_s6 }
 0x166   : > { %295 = sbr.rel (%p439_p0) target bundleno = 368 (0x170), region = 40 }
 0x167   : > { %v300_v47 = vadd.s32 (!%p439_p0), %v299_v46, %v297_v45  ;;  %v298_v48 = vadd.s32 (!%p439_p0), 8, %v297_v45 }
 0x169   : > { %vm304_vm4 = vcmp.lt.s32.totalorder (!%p439_p0), %v300_v47, 16  ;;  %v301_v50 = vadd.s32 (!%p439_p0), %v299_v46, %v298_v48 }
 0x16a   : > { %v302_v49 = vld [vmem:[#allocation2] sm:$0xff] (!%p439_p0)  ;;  %v306_v51 = vsel (!%p439_p0), %vm304_vm4, %v276_v37, 0.0  ;;  %v303_v52 = vld [vmem:[#allocation2 + $0x8] sm:$0xff] (!%p439_p0) }
 0x16b   : > { %v308_v53 = vadd.f32 (!%p439_p0), %v306_v51, %v302_v49  ;;  %vm305_vm5 = vcmp.lt.s32.totalorder (!%p439_p0), %v301_v50, 16 }
 0x16c   : > { %v307_v54 = vsel (!%p439_p0), %vm305_vm5, %v277_v40, 0.0 }
 0x16d   : > { %311 = vst.msk [vmem:[#allocation2] sm:$0xff] %vm224_vm3, %v308_v53  ;;  %v309_v55 = vadd.f32 %v307_v54, %v303_v52 }
 0x16f   : > { %312 = vst.msk [vmem:[#allocation2 + $0x8] sm:$0xff] %vm224_vm3, %v309_v55 }
 0x170 PF: > { %s441_s15 = sshll.u32 %s584_s12, 7  ;;  %s348_s16 = sshll.u32 %s195_s8, 4  ;;  %s709_s16 = int_to_ptr.vmem [resolvable:$true] %s348_s16 }
 0x171   : > { %s707_s23 = scalar_lea.hbm %s760_s2, %s441_s15  ;;  %s335_s25 = scalar_lea.sflag [#allocation4], %s193_s4 }
 0x172   : > { %s514_s26 = scalar_lea.vmem %s709_s16, 128  ;;  %s597_s12 = smov [#allocation3]  }
 0x173   : > { %p515_p1 = scmp.ne.s32.totalorder %s709_s16, %s514_s26  ;;  %s518_s27 = sshll.u32 %s597_s12, 4  ;;  %s519_s27 = int_to_ptr.vmem [resolvable:$false] %s518_s27 }
 0x174   : > { %s520_s28 = scalar_lea.vmem %s519_s27, 256  ;;  %p521_p5 = scmp.lt.s32.totalorder %s709_s16, %s519_s27 }
 0x175   : > { %p516_p2 = pnand %p515_p1, %p653_p4  ;;  %p522_p6 = scmp.lt.s32.totalorder %s520_s28, %s514_s26 }
 0x176   : > { %v317_v57 = vld [vmem:[#allocation2 + $0x8] sm:$0xff] }
 0x177   : > { %v316_v56 = vld [vmem:[#allocation2] sm:$0xff]  ;;  %v320_v59 = vsel %vm224_vm3, %v317_v57, 0.0  ;;  %p517_p3 = pneg %p516_p2  ;;  %p523_p7 = por %p522_p6, %p521_p5 }
 0x178   : > { %v319_v58 = vsel %vm224_vm3, %v316_v56, 0.0 }
 0x179   : > { %v321_v60 = vadd.f32 %v320_v59, %v319_v58  ;;  %p524_p9 = pnand %p523_p7, %p517_p3 }
 0x17b   : > { %322 = vadd.xlane.f32.xlu0 %v321_v60 }
 0x208   : > { %v323_v61 = vpop.xlane.xlu0 %322 }
 0x209   : > { %v324_v62 = vrot.slane %v323_v61, 4 }
 0x20b   : > { %v325_v63 = vadd.f32 %v324_v62, %v323_v61 }
 0x20d   : > { %v326_v0 = vrot.slane %v325_v63, 2 }
 0x20f   : > { %v327_v1 = vadd.f32 %v326_v0, %v325_v63 }
 0x211   : > { %v328_v2 = vrot.slane %v327_v1, 1 }
 0x213   : > { %v329_v3 = vadd.f32 %v328_v2, %v327_v1 }
 0x215   : > { %444 = vpush %v329_v3 }
 0x246   : > { %s445_s24 = spop %444 }
 0x247   : > { %v331_v4 = vstv %s445_s24 }
 0x248   : > { %333 = vst [vmem:[%s195_s8] sm:$0xff] %v331_v4 }
 0x249   : > { %527 = shalt.err (!%p524_p9)
}
 0x24a   : > { %s528_s29 = scalar_lea.hbm %s707_s23, 128  ;;  %s532_s4 = scalar_lea.hbm %s760_s2, 256 }
 0x24b   : > { %p529_p10 = scmp.ne.s32.totalorder %s707_s23, %s528_s29  ;;  %p533_p13 = scmp.lt.u32.totalorder %s707_s23, %s760_s2 }
 0x24c   : > { %p534_p0 = scmp.lt.u32.totalorder %s532_s4, %s528_s29  ;;  %p536_p2 = scmp.lt.u32.totalorder %s528_s29, %s707_s23 }
 0x24d   : > { %p530_p11 = pnand %p529_p10, %p653_p4 }
 0x24e   : > { %p535_p1 = por %p534_p0, %p533_p13 }
 0x24f   : > { %p531_p12 = pneg %p530_p11 }
 0x250   : > { %p537_p3 = por %p536_p2, %p535_p1 }
 0x252   : > { %p538_p5 = pnand %p537_p3, %p531_p12 }
 0x254   : > { %541 = shalt.err (!%p538_p5)
}
 0x255   : > { %446 = dma.vmem_to_hbm [thread:$0]  (%p653_p4), %s709_s16, 128, %s707_s23, %s335_s25  }
 0x256 PF: > { %p452_p6 = scmp.ge.s32.totalorder %s592_s14, 2  ;;  %s360_s7 = sand.u32 1, %s572_s9  }
 0x257   : > { %s361_s8 = scalar_lea.sflag [#allocation4], %s360_s7 }
 0x258   : > { %p449_p7 = pnand %p452_p6, %p660_p8 }
 0x25a   : > { %567 = dma.done.wait (!%p449_p7), %s361_s8, 128  }
 0x25b   : > { %569 = vsyncadd (!%p449_p7), %s361_s8, 4294967168  ;;  %s15_s14 = sadd.s32 1, %s592_s14   ;;  %s763_s9 = smov %s576_s10 }
 0x25c   : > { %p12_p9 = scmp.ge.s32.totalorder %s15_s14, 4   ;;  %s764_s10 = smov %s580_s11 }
 0x25d   : > { %s765_s11 = smov %s666_s22  ;;  %s766_s12 = smov %s588_s13 }
 0x25e   : > { %s767_s13 = smov %s769_s17  ;;  %14 = sbr.rel (!%p12_p9) target bundleno = 4 (0x4), region = 82 }
 0x265   :  { %366 = vsyncpa [#allocation4], 1 }
 0x266   :  { %368 = vsyncpa [#allocation4 + $0x1], 1 }

</bundles_post_ra>
